<compile_context>
chip_gen: v5e
topology: v5e:2x2
jax: 0.10.0
libtpu: 0.0.40
codegen_flags: <defaults>
</compile_context>

<pallas_src>
import functools

import jax
import jax.numpy as jnp
from jax.experimental import pallas as pl
from jax.experimental.pallas import tpu as pltpu


def _addnorm_kernel(h_ref, x_ref, w_ref, p_ref, o_ref, *, eps):
    # (tm, K) x (N, K) contracted on K -> (tm, N) on the MXU, f32 accumulation.
    # Contracting dim 1 of both operands avoids any wrapper-side weight transpose.
    acc = jax.lax.dot_general(
        h_ref[...], w_ref[...],
        dimension_numbers=(((1,), (1,)), ((), ())),
        preferred_element_type=jnp.float32)

    bias = p_ref[0, :].astype(jnp.float32)
    gamma = p_ref[1, :].astype(jnp.float32)
    beta = p_ref[2, :].astype(jnp.float32)

    # TODO(synk): dropout is identity in eval mode; training-mode dropout (PRNG mask) not emitted.
    y = acc + bias + x_ref[...].astype(jnp.float32)          # bias + residual add

    # Fused single-pass LayerNorm stats over the hidden dim:
    #   mean = E[y], var = E[y^2] - mean^2  (biased variance, matches PyTorch LayerNorm)
    n_inv = 1.0 / y.shape[-1]
    mean = jnp.sum(y, axis=-1, keepdims=True) * n_inv
    ex2 = jnp.sum(y * y, axis=-1, keepdims=True) * n_inv
    var = jnp.maximum(ex2 - mean * mean, 0.0)
    normed = (y - mean) * jax.lax.rsqrt(var + eps)
    o_ref[...] = (normed * gamma + beta).astype(o_ref.dtype)


def _round_up(a, b):
    return (a + b - 1) // b * b


def bert_add_norm(hidden_states, input_tensor, weight, bias, gamma, beta,
                  *, layer_norm_eps=1e-12, tile_m=256):
    """hidden_states: (B, S, intermediate), input_tensor: (B, S, hidden).
    weight: (hidden, intermediate)  [PyTorch nn.Linear layout, passed untransposed],
    bias/gamma/beta: (hidden,)."""
    B, S, K = hidden_states.shape
    N = input_tensor.shape[-1]
    assert weight.shape == (N, K)
    M = B * S

    # Clamp the row tile to the problem size (keep a multiple of 8 sublanes; use >=16
    # if activations are bf16), then pad M up to a whole number of tiles so real
    # (batch*seq) values that don't divide 256 still take the big-tile path.
    tm = min(tile_m, _round_up(M, 8))
    Mp = _round_up(M, tm)

    h2 = hidden_states.reshape(M, K)
    x2 = input_tensor.reshape(M, N)
    if Mp != M:
        h2 = jnp.pad(h2, ((0, Mp - M), (0, 0)))
        x2 = jnp.pad(x2, ((0, Mp - M), (0, 0)))

    # Pack the three (N,) parameter vectors into a single (3, N) resident block.
    params = jnp.stack([bias, gamma, beta], axis=0)

    kernel = functools.partial(_addnorm_kernel, eps=layer_norm_eps)

    out2 = pl.pallas_call(
        kernel,
        out_shape=jax.ShapeDtypeStruct((Mp, N), hidden_states.dtype),
        grid_spec=pltpu.PrefetchScalarGridSpec(
            num_scalar_prefetch=0,
            grid=(Mp // tm,),
            in_specs=[
                pl.BlockSpec((tm, K), lambda i: (i, 0)),        # hidden_states rows
                pl.BlockSpec((tm, N), lambda i: (i, 0)),        # residual rows
                pl.BlockSpec((N, K), lambda i: (0, 0),          # weight, resident,
                             pipeline_mode=pl.Buffered(1)),     #   single-buffered
                pl.BlockSpec((3, N), lambda i: (0, 0)),         # [bias; gamma; beta]
            ],
            out_specs=pl.BlockSpec((tm, N), lambda i: (i, 0)),
        ),
        compiler_params=pltpu.CompilerParams(
            dimension_semantics=("parallel",),
            # Room for a resident multi-MB weight + 256-row tiles on v5e's 16 MiB
            # scoped default, while staying under v7x's 64 MiB physical VMEM.
            vmem_limit_bytes=48 * 1024 * 1024,
        ),
    )(h2, x2, weight, params)

    return out2[:M].reshape(B, S, N)


if __name__ == "__main__":
    # Small, module-consistent shapes
    batch, seq = 2, 8
    intermediate_size, hidden_size = 64, 32
    layer_norm_eps = 1e-12

    key = jax.random.PRNGKey(0)
    k_h, k_x, k_w, k_b, k_g, k_beta = jax.random.split(key, 6)

    hidden_states = jax.random.normal(k_h, (batch, seq, intermediate_size), jnp.float32)
    input_tensor = jax.random.normal(k_x, (batch, seq, hidden_size), jnp.float32)

    # Deterministic parameter init (nn.Linear-like scale; LayerNorm gamma~1, beta~0)
    weight = jax.random.normal(k_w, (hidden_size, intermediate_size), jnp.float32) * 0.02
    bias = jax.random.normal(k_b, (hidden_size,), jnp.float32) * 0.02
    gamma = jnp.ones((hidden_size,), jnp.float32) + 0.01 * jax.random.normal(k_g, (hidden_size,), jnp.float32)
    beta = 0.01 * jax.random.normal(k_beta, (hidden_size,), jnp.float32)

    out = bert_add_norm(hidden_states, input_tensor, weight, bias, gamma, beta,
                        layer_norm_eps=layer_norm_eps)
    out = jax.block_until_ready(out)

    # Pure-JAX reference check
    ref_h = jnp.einsum("bsk,nk->bsn", hidden_states, weight) + bias
    ref_y = ref_h + input_tensor
    mu = jnp.mean(ref_y, axis=-1, keepdims=True)
    var = jnp.mean((ref_y - mu) ** 2, axis=-1, keepdims=True)
    ref = (ref_y - mu) / jnp.sqrt(var + layer_norm_eps) * gamma + beta
    assert jnp.allclose(out, ref, atol=1e-5, rtol=1e-5), "mismatch vs reference"

    print("KERNEL_OK")
</pallas_src>

<mosaic_0001>
module attributes {stable_mosaic.version = 11 : i64} {
  func.func @_addnorm_kernel(%arg0: i32, %arg1: memref<16x64xf32, #tpu.memory_space<vmem>>, %arg2: memref<16x32xf32, #tpu.memory_space<vmem>>, %arg3: memref<32x64xf32, #tpu.memory_space<vmem>>, %arg4: memref<3x32xf32, #tpu.memory_space<vmem>>, %arg5: memref<16x32xf32, #tpu.memory_space<vmem>>) attributes {dimension_semantics = [#tpu.dimension_semantics<parallel>], iteration_bounds = array<i64: 1>, scalar_prefetch = 0 : i64, scratch_operands = 0 : i64, tpu.core_type = #tpu.core_type<tc>, window_params = [{transform_indices = @transform_0, window_bounds = array<i64: 16, 64>}, {transform_indices = @transform_1, window_bounds = array<i64: 16, 32>}, {pipeline_mode = #tpu.pipeline_mode<synchronous>, transform_indices = @transform_2, window_bounds = array<i64: 32, 64>}, {pipeline_mode = #tpu.pipeline_mode<synchronous>, transform_indices = @transform_3, window_bounds = array<i64: 3, 32>}, {transform_indices = @transform_4, window_bounds = array<i64: 16, 32>}]} {
    %c0 = arith.constant 0 : index
    %c0_0 = arith.constant 0 : index
    %0 = vector.load %arg1[%c0, %c0_0] : memref<16x64xf32, #tpu.memory_space<vmem>>, vector<16x64xf32>
    %c0_1 = arith.constant 0 : index
    %c0_2 = arith.constant 0 : index
    %1 = vector.load %arg3[%c0_1, %c0_2] : memref<32x64xf32, #tpu.memory_space<vmem>>, vector<32x64xf32>
    %cst = arith.constant dense<0.000000e+00> : vector<16x32xf32>
    %2 = tpu.matmul %0, %1, %cst {dimension_numbers = #tpu.dot_dimension_numbers<[1], [1], [0], [0], [0, 0, 1, 0], [], []>} : vector<16x64xf32>, vector<32x64xf32>, vector<16x32xf32> -> vector<16x32xf32>
    %c0_3 = arith.constant 0 : index
    %c0_4 = arith.constant 0 : index
    %3 = vector.load %arg4[%c0_3, %c0_4] : memref<3x32xf32, #tpu.memory_space<vmem>>, vector<1x32xf32>
    %4 = vector.shape_cast %3 : vector<1x32xf32> to vector<32xf32>
    %c1 = arith.constant 1 : index
    %c0_5 = arith.constant 0 : index
    %5 = vector.load %arg4[%c1, %c0_5] : memref<3x32xf32, #tpu.memory_space<vmem>>, vector<1x32xf32>
    %6 = vector.shape_cast %5 : vector<1x32xf32> to vector<32xf32>
    %c2 = arith.constant 2 : index
    %c0_6 = arith.constant 0 : index
    %7 = vector.load %arg4[%c2, %c0_6] : memref<3x32xf32, #tpu.memory_space<vmem>>, vector<1x32xf32>
    %8 = vector.shape_cast %7 : vector<1x32xf32> to vector<32xf32>
    %9 = vector.shape_cast %4 : vector<32xf32> to vector<1x32xf32>
    %10 = vector.broadcast %9 : vector<1x32xf32> to vector<16x32xf32>
    %11 = arith.addf %2, %10 : vector<16x32xf32>
    %c0_7 = arith.constant 0 : index
    %c0_8 = arith.constant 0 : index
    %12 = vector.load %arg2[%c0_7, %c0_8] : memref<16x32xf32, #tpu.memory_space<vmem>>, vector<16x32xf32>
    %13 = arith.addf %11, %12 : vector<16x32xf32>
    %cst_9 = arith.constant dense<0.000000e+00> : vector<16xf32>
    %14 = vector.multi_reduction <add>, %13, %cst_9 [1] : vector<16x32xf32> to vector<16xf32>
    %15 = vector.shape_cast %14 : vector<16xf32> to vector<16x1xf32>
    %cst_10 = arith.constant 3.125000e-02 : f32
    %16 = vector.broadcast %cst_10 : f32 to vector<16x1xf32>
    %17 = arith.mulf %15, %16 : vector<16x1xf32>
    %18 = arith.mulf %13, %13 : vector<16x32xf32>
    %cst_11 = arith.constant dense<0.000000e+00> : vector<16xf32>
    %19 = vector.multi_reduction <add>, %18, %cst_11 [1] : vector<16x32xf32> to vector<16xf32>
    %20 = vector.shape_cast %19 : vector<16xf32> to vector<16x1xf32>
    %cst_12 = arith.constant 3.125000e-02 : f32
    %21 = vector.broadcast %cst_12 : f32 to vector<16x1xf32>
    %22 = arith.mulf %20, %21 : vector<16x1xf32>
    %23 = arith.mulf %17, %17 : vector<16x1xf32>
    %24 = arith.subf %22, %23 : vector<16x1xf32>
    %cst_13 = arith.constant 0.000000e+00 : f32
    %25 = vector.broadcast %cst_13 : f32 to vector<16x1xf32>
    %26 = arith.maximumf %24, %25 : vector<16x1xf32>
    %27 = vector.broadcast %17 : vector<16x1xf32> to vector<16x32xf32>
    %28 = arith.subf %13, %27 : vector<16x32xf32>
    %cst_14 = arith.constant 9.99999996E-13 : f32
    %29 = vector.broadcast %cst_14 : f32 to vector<16x1xf32>
    %30 = arith.addf %26, %29 : vector<16x1xf32>
    %31 = math.rsqrt %30 : vector<16x1xf32>
    %32 = vector.broadcast %31 : vector<16x1xf32> to vector<16x32xf32>
    %33 = arith.mulf %28, %32 : vector<16x32xf32>
    %34 = vector.shape_cast %6 : vector<32xf32> to vector<1x32xf32>
    %35 = vector.broadcast %34 : vector<1x32xf32> to vector<16x32xf32>
    %36 = arith.mulf %33, %35 : vector<16x32xf32>
    %37 = vector.shape_cast %8 : vector<32xf32> to vector<1x32xf32>
    %38 = vector.broadcast %37 : vector<1x32xf32> to vector<16x32xf32>
    %39 = arith.addf %36, %38 : vector<16x32xf32>
    %c0_15 = arith.constant 0 : index
    %c0_16 = arith.constant 0 : index
    %40 = vector.load %arg5[%c0_15, %c0_16] : memref<16x32xf32, #tpu.memory_space<vmem>>, vector<16x32xf32>
    tpu.vector_store %arg5[%c0_15, %c0_16], %39 {strides = array<i32>} : memref<16x32xf32, #tpu.memory_space<vmem>>, vector<16x32xf32>,
    return
  }
  func.func @transform_0(%arg0: i32) -> (i32, i32) {
    %c0_i32 = arith.constant 0 : i32
    %c0_i32_0 = arith.constant 0 : i32
    return %arg0, %c0_i32 : i32, i32
  }
  func.func @transform_1(%arg0: i32) -> (i32, i32) {
    %c0_i32 = arith.constant 0 : i32
    %c0_i32_0 = arith.constant 0 : i32
    return %arg0, %c0_i32 : i32, i32
  }
  func.func @transform_2(%arg0: i32) -> (i32, i32) {
    %c0_i32 = arith.constant 0 : i32
    %c0_i32_0 = arith.constant 0 : i32
    %c0_i32_1 = arith.constant 0 : i32
    return %c0_i32, %c0_i32_0 : i32, i32
  }
  func.func @transform_3(%arg0: i32) -> (i32, i32) {
    %c0_i32 = arith.constant 0 : i32
    %c0_i32_0 = arith.constant 0 : i32
    %c0_i32_1 = arith.constant 0 : i32
    return %c0_i32, %c0_i32_0 : i32, i32
  }
  func.func @transform_4(%arg0: i32) -> (i32, i32) {
    %c0_i32 = arith.constant 0 : i32
    %c0_i32_0 = arith.constant 0 : i32
    return %arg0, %c0_i32 : i32, i32
  }
}

</mosaic_0001>

<bundles_post_ra>
// kernel: tpu_custom_call.1
= control target key start
LH: loop header
LB: loop body
LE: loop exit
PB: predicated region body
PF: predicated region fallthrough
CT: control target
= control target key end

     0   :  { %9 = vsyncpa [#allocation3], 0  ;;  %s442_s0 = inlined_call_operand.hbm [shape: f32[16,64], index: 0, kind: input, shape index: {}]   ;;  %s443_s1 = inlined_call_operand.hbm [shape: f32[16,32], index: 1, kind: input, shape index: {}]   ;;  %s444_s2 = inlined_call_operand.hbm [shape: f32[32,64], index: 2, kind: input, shape index: {}]   ;;  %s445_s3 = inlined_call_operand.hbm [shape: f32[3,32], index: 3, kind: input, shape index: {}]   ;;  %s446_s4 = inlined_call_operand.hbm [shape: f32[16,32], index: 4, kind: output, shape index: {}]  }
   0x1   :  { %10 = vsyncpa [#allocation6], 0 }
   0x2   :  { %11 = vsyncpa [#allocation9], 0 }
   0x3   :  { %12 = vsyncpa [#allocation4], 0  ;;  %s30_s17 = sshll.u32 %s443_s1, 4  ;;  %s367_s18 = smov [#allocation5]   ;;  %s31_s17 = int_to_ptr.hbm [resolvable:$true] %s30_s17 }
   0x4   :  { %s32_s19 = sshll.u32 %s367_s18, 4  ;;  %s17_s22 = sshll.u32 %s442_s0, 4  ;;  %s33_s19 = int_to_ptr.vmem [resolvable:$true] %s32_s19  ;;  %s18_s22 = int_to_ptr.hbm [resolvable:$true] %s17_s22 }
   0x5   :  { %s368_s23 = smov 128   ;;  %s369_s24 = smov 8  }
   0x6   :  { %38 = dma.hbm_to_vmem [thread:$0]  %s31_s17, 256, %s33_s19, [#allocation6], %s368_s23, %s368_s23, %s369_s24  }
   0x7   :  { %s370_s25 = smov [#allocation2]   ;;  %s43_s1 = sshll.u32 %s444_s2, 4  ;;  %s44_s1 = int_to_ptr.hbm [resolvable:$true] %s43_s1 }
   0x8   :  { %s19_s26 = sshll.u32 %s370_s25, 4  ;;  %s57_s30 = sshll.u32 %s445_s3, 4  ;;  %s20_s26 = int_to_ptr.vmem [resolvable:$true] %s19_s26  ;;  %s58_s30 = int_to_ptr.hbm [resolvable:$true] %s57_s30 }
   0x9   :  { %25 = dma.hbm_to_vmem [thread:$0]  %s18_s22, 256, %s20_s26, [#allocation3], %s368_s23, %s368_s23, %s369_s24  }
   0xa   :  { %s371_s5 = smov [#allocation7]   ;;  %s372_s7 = smov [#allocation8]  }
   0xb   :  { %s45_s6 = sshll.u32 %s371_s5, 4  ;;  %s59_s2 = sshll.u32 %s372_s7, 4  ;;  %s46_s6 = int_to_ptr.vmem [resolvable:$true] %s45_s6  ;;  %s60_s2 = int_to_ptr.vmem [resolvable:$true] %s59_s2 }
   0xc   :  { %51 = dma.hbm_to_vmem [thread:$0]  %s44_s1, 512, %s46_s6, [#allocation6], %s368_s23, %s368_s23, %s369_s24  }
   0xd   :  { %62 = dma.hbm_to_vmem [thread:$0]  %s58_s30, 64, %s60_s2, [#allocation9]  }
   0xe   :  { %359 = dma.done.wait [#allocation3], 256  }
   0xf   :  { %360 = vsyncadd [#allocation3], 4294967040 }
  0x10   :  { %361 = dma.done.wait [#allocation6], 768  }
  0x11   :  { %362 = vsyncadd [#allocation6], 4294966528 }
  0x12   :  { %363 = dma.done.wait [#allocation9], 64  }
  0x13   :  { %364 = vsyncadd [#allocation9], 4294967232  ;;  %vm89_vm0 = vcmask 523264   ;;  %v84_v0 = vld [vmem:[#allocation7 + $0x18] sm:$0xff]  ;;  %v83_v1 = vld [vmem:[#allocation7 + $0x10] sm:$0xff]  ;;  %vm135_vm1 = vcmask 261120  }
  0x14   :  { %215 = vmatpush.xpose.msk.msra.mxu0 %vm89_vm0, %v84_v0  ;;  %221 = vmatpush.xpose.msk.msra.mxu1 %vm89_vm0, %v84_v0  ;;  %v82_v2 = vld [vmem:[#allocation7 + $0x8] sm:$0xff]  ;;  %v81_v3 = vld [vmem:[#allocation7] sm:$0xff]  ;;  %v131_v8 = vld [vmem:[#allocation5] sm:$0xff]  ;;  %s373_s3 = smov [#allocation10]   ;;  %s200_s11 = sshll.u32 %s446_s4, 4  ;;  %s201_s11 = int_to_ptr.hbm [resolvable:$true] %s200_s11 }
  0x15   :  { %v79_v4 = vld [vmem:[#allocation2] sm:$0xff]  ;;  %v80_v5 = vld [vmem:[#allocation2 + $0x8] sm:$0xff]  ;;  %v132_v12 = vld [vmem:[#allocation5 + $0x8] sm:$0xff]  ;;  %s198_s8 = sshll.u32 %s373_s3, 4  ;;  %s199_s8 = int_to_ptr.vmem [resolvable:$true] %s198_s8 }
  0x16   :  { %v232_v6 = vld [vmem:[#allocation8] ss:$0 sm:$0xff]  ;;  %v233_v46 = vld [vmem:[#allocation8 + $0x1] ss:$0 sm:$0xff]  ;;  %v234_v50 = vld [vmem:[#allocation8 + $0x2] ss:$0 sm:$0xff] }
  0x18   :  { %216 = vmatpush.xpose.msk.msra.mxu0 %vm89_vm0, %v83_v1  ;;  %222 = vmatpush.xpose.msk.msra.mxu1 %vm89_vm0, %v83_v1 }
  0x1c   :  { %217 = vmatpush.xpose.msk.msra.mxu0 %vm89_vm0, %v82_v2  ;;  %223 = vmatpush.xpose.msk.msra.mxu1 %vm89_vm0, %v82_v2 }
  0x20   :  { %218 = vmatpush.xpose.msk.msra.mxu0 %vm89_vm0, %v81_v3  ;;  %224 = vmatpush.xpose.msk.msra.mxu1 %vm89_vm0, %v81_v3 }
  0x23   :  { %219 = vmatmul.msk.f32.vlgmr.msra.gmra.mxu0 %vm89_vm0, %v79_v4  ;;  %220 = vmatmul.msk.f32.vlgmr.msra.gmra.mxu1 %vm89_vm0, %v80_v5 }
  0xa0   :  { %v125_v7 = vpop.f32.mrf.mxu0  ;;  %v128_v9 = vpop.f32.mrf.mxu1 }
  0xa1   :  { %v126_v10 = vadd.f32 %v232_v6, %v125_v7  ;;  %v129_v11 = vadd.f32 %v232_v6, %v128_v9 }
  0xa3   :  { %v133_v13 = vadd.f32 %v131_v8, %v126_v10  ;;  %v134_v15 = vadd.f32 %v132_v12, %v129_v11 }
  0xa5   :  { %v136_v14 = vsel %vm135_vm1, %v133_v13, 0.0  ;;  %v144_v16 = vmul.f32 %v133_v13, %v133_v13  ;;  %v145_v18 = vmul.f32 %v134_v15, %v134_v15  ;;  %v139_v19 = vsel %vm135_vm1, %v134_v15, 0.0 }
  0xa6   :  { %137 = vadd.xlane.f32.xlu0 %v136_v14 }
  0xa7   :  { %v146_v17 = vsel %vm135_vm1, %v144_v16, 0.0  ;;  %v149_v20 = vsel %vm135_vm1, %v145_v18, 0.0 }
  0xa8   :  { %147 = vadd.xlane.f32.xlu1 %v146_v17 }
  0xae   :  { %140 = vadd.xlane.f32.xlu0 %v139_v19 }
  0xb0   :  { %150 = vadd.xlane.f32.xlu1 %v149_v20 }
 0x119   :  { %v138_v21 = vpop.xlane.xlu0 %137 }
 0x11a   :  { %v142_v22 = vmul.f32 0.03125, %v138_v21 }
 0x11b   :  { %v148_v23 = vpop.xlane.xlu1 %147 }
 0x11c   :  { %v154_v24 = vmul.f32 %v142_v22, %v142_v22  ;;  %v152_v25 = vmul.f32 0.03125, %v148_v23  ;;  %v160_v44 = vsub.f32 %v133_v13, %v142_v22 }
 0x11e   :  { %v156_v26 = vsub.f32 %v152_v25, %v154_v24 }
 0x120   :  { %v158_v27 = vmax.f32 %v156_v26, 0.0 }
 0x121   :  { %v141_v28 = vpop.xlane.xlu0 %140 }
 0x122   :  { %v162_v29 = vadd.f32 1e-12, %v158_v27  ;;  %v143_v30 = vmul.f32 0.03125, %v141_v28 }
 0x123   :  { %v151_v31 = vpop.xlane.xlu1 %150 }
 0x124   :  { %235 = vrsqrt.f32 %v162_v29  ;;  %v155_v32 = vmul.f32 %v143_v30, %v143_v30  ;;  %v153_v33 = vmul.f32 0.03125, %v151_v31  ;;  %vm170_vm3 = vweird.f32 %v162_v29 }
 0x125   :  { %v161_v56 = vsub.f32 %v134_v15, %v143_v30 }
 0x126   :  { %v157_v34 = vsub.f32 %v153_v33, %v155_v32 }
 0x128   :  { %v159_v35 = vmax.f32 %v157_v34, 0.0 }
 0x12a   :  { %v236_v36 = vpop.eup %235  ;;  %v163_v38 = vadd.f32 1e-12, %v159_v35 }
 0x12b   :  { %v165_v37 = vmul.f32 %v236_v36, %v162_v29  ;;  %vm171_vm2 = vweird.f32 %v236_v36 }
 0x12c   :  { %237 = vrsqrt.f32 %v163_v38  ;;  %vm172_vm4 = vmor %vm170_vm3, %vm171_vm2  ;;  %vm180_vm6 = vweird.f32 %v163_v38 }
 0x12d   :  { %v166_v39 = vmul.f32 %v236_v36, %v165_v37 }
 0x12f   :  { %v167_v40 = vmul.f32 0.5, %v166_v39 }
 0x131   :  { %v168_v41 = vsub.f32 1.5, %v167_v40 }
 0x132   :  { %v238_v42 = vpop.eup %237 }
 0x133   :  { %v169_v43 = vmul.f32 %v236_v36, %v168_v41  ;;  %v175_v45 = vmul.f32 %v238_v42, %v163_v38  ;;  %vm181_vm5 = vweird.f32 %v238_v42 }
 0x134   :  { %vm182_vm7 = vmor %vm180_vm6, %vm181_vm5 }
 0x135   :  { %v173_v47 = vsel %vm172_vm4, %v236_v36, %v169_v43  ;;  %v176_v49 = vmul.f32 %v238_v42, %v175_v45 }
 0x136   :  { %v184_v48 = vmul.f32 %v173_v47, %v160_v44 }
 0x137   :  { %v177_v51 = vmul.f32 0.5, %v176_v49 }
 0x138   :  { %v187_v52 = vmul.f32 %v233_v46, %v184_v48 }
 0x139   :  { %v178_v53 = vsub.f32 1.5, %v177_v51 }
 0x13a   :  { %v190_v54 = vadd.f32 %v234_v50, %v187_v52 }
 0x13b   :  { %v179_v55 = vmul.f32 %v238_v42, %v178_v53 }
 0x13c   :  { %192 = vst.msk [vmem:[#allocation10] sm:$0xff] %vm135_vm1, %v190_v54 }
 0x13d   :  { %v183_v57 = vsel %vm182_vm7, %v238_v42, %v179_v55 }
 0x13e   :  { %v185_v58 = vmul.f32 %v183_v57, %v161_v56 }
 0x140   :  { %v188_v59 = vmul.f32 %v233_v46, %v185_v58 }
 0x142   :  { %v191_v60 = vadd.f32 %v234_v50, %v188_v59 }
 0x144   :  { %193 = vst.msk [vmem:[#allocation10 + $0x8] sm:$0xff] %vm135_vm1, %v191_v60 }
 0x145   :  { %206 = dma.vmem_to_hbm [thread:$0]  %s199_s8, 256, %s201_s11, [#allocation4], %s368_s23, %s368_s23, %s369_s24  }
 0x146   :  { %365 = dma.done.wait [#allocation4], 256  }
 0x147   :  { %366 = vsyncadd [#allocation4], 4294967040 }
 0x148   :  { %211 = vsyncpa [#allocation3], 1 }
 0x149   :  { %212 = vsyncpa [#allocation6], 1 }
 0x14a   :  { %213 = vsyncpa [#allocation9], 1 }
 0x14b   :  { %214 = vsyncpa [#allocation4], 1 }

</bundles_post_ra>
